<compile_context>
chip_gen: v7x
topology: tpu7x:2x2x1
jax: 0.10.0
libtpu: 0.0.40
codegen_flags: <defaults>
</compile_context>

<pallas_src>
import jax
import jax.numpy as jnp
from jax.experimental import pallas as pl
from jax.experimental.pallas import tpu as pltpu


def _xavier_uniform(key, out_features, in_features, dtype=jnp.float32):
    """nn.init.xavier_uniform_ for a PyTorch Linear weight of shape (out, in)."""
    bound = (6.0 / (in_features + out_features)) ** 0.5
    return jax.random.uniform(
        key, (out_features, in_features), dtype=dtype, minval=-bound, maxval=bound
    )


def _rnn_cell_kernel(
    combined_ref,            # [B, I+H]   cat(x, hidden_state) (done in wrapper)
    w_cat_ref, b_cat_ref,    # [(I+H), 2H], [1, 2H]  fused in2hidden | in2output
    w_o_ref, b_o_ref,        # [2H, O] (rows [0,H) are zeros), [1, O]
    out_ref, hid_ref,        # [B, O], [B, H]
):
    H = hid_ref.shape[1]

    # One fused MXU pass + one tanh for both in2hidden and in2output.
    act = jnp.tanh(
        jnp.dot(combined_ref[...], w_cat_ref[...],
                preferred_element_type=jnp.float32)
        + b_cat_ref[...]
    )                                                          # [B, 2H] f32

    # in3output(output_1): zero-padded weight means only the output_1 half
    # (columns [H, 2H) of `act`) contributes -> no unaligned lane slice needed.
    logits = (
        jnp.dot(act, w_o_ref[...], preferred_element_type=jnp.float32)
        + b_o_ref[...]
    )                                                          # [B, O]

    # Numerically-stable softmax; approx reciprocal goes to the idle EUP slot.
    z = logits - jnp.max(logits, axis=1, keepdims=True)
    e = jnp.exp(z)
    inv_denom = pl.reciprocal(jnp.sum(e, axis=1, keepdims=True), approx=True)
    out_ref[...] = (e * inv_denom).astype(out_ref.dtype)

    # hidden = tanh(in2hidden(combined)) is the first H columns (lane 0 start).
    hid_ref[...] = act[:, :H].astype(hid_ref.dtype)


def prepare_params(params):
    """One-time conversion of PyTorch-layout params to the kernel layout.

    PyTorch Linear stores weight as (out, in); the kernel wants (in, out), the
    two in2* layers fused along the output axis, and in3output zero-padded so
    it consumes the whole fused [B, 2H] activation.
    """
    H = params["w_ih"].shape[0]
    O = params["w_o"].shape[0]
    w_cat = jnp.concatenate([params["w_ih"].T, params["w_io"].T], axis=1)     # [(I+H), 2H]
    b_cat = jnp.concatenate([params["b_ih"], params["b_io"]]).reshape(1, 2 * H)
    w_o_pad = jnp.concatenate(
        [jnp.zeros((H, O), params["w_o"].dtype), params["w_o"].T], axis=0
    )                                                                          # [2H, O]
    b_o = params["b_o"].reshape(1, O)
    return {"w_cat": w_cat, "b_cat": b_cat, "w_o": w_o_pad, "b_o": b_o}


def custom_rnn_forward(x, hidden_state, kp):
    """Runs one CustomRNN.forward step. Returns (output, hidden)."""
    B, I = x.shape
    H = hidden_state.shape[1]
    O = kp["b_o"].shape[1]

    # XLA-level concat (outside the kernel), feeding a single kernel input.
    combined = jnp.concatenate([x, hidden_state], axis=1)      # [B, I+H]

    flops = 2 * B * (I + H) * (2 * H) + 2 * B * (2 * H) * O
    transcendentals = B * (2 * H + O)                           # tanh + exp
    bytes_accessed = 4 * (
        combined.size + kp["w_cat"].size + kp["b_cat"].size
        + kp["w_o"].size + kp["b_o"].size + B * O + B * H
    )

    vmem = pl.BlockSpec(memory_space=pltpu.MemorySpace.VMEM)
    out, hid = pl.pallas_call(
        _rnn_cell_kernel,
        out_shape=(
            jax.ShapeDtypeStruct((B, O), x.dtype),
            jax.ShapeDtypeStruct((B, H), x.dtype),
        ),
        in_specs=[vmem] * 5,
        out_specs=(vmem, vmem),
        cost_estimate=pl.CostEstimate(
            flops=int(flops),
            transcendentals=int(transcendentals),
            bytes_accessed=int(bytes_accessed),
        ),
    )(combined, kp["w_cat"], kp["b_cat"], kp["w_o"], kp["b_o"])
    return out, hid


def init_params(key, input_size, hidden_size, output_size):
    k1, k2, k3 = jax.random.split(key, 3)
    return {
        # PyTorch Linear weight layout: (out_features, in_features)
        "w_ih": _xavier_uniform(k1, hidden_size, input_size + hidden_size),
        "b_ih": jnp.zeros((hidden_size,), jnp.float32),
        "w_io": _xavier_uniform(k2, hidden_size, input_size + hidden_size),
        "b_io": jnp.zeros((hidden_size,), jnp.float32),
        "w_o": _xavier_uniform(k3, output_size, hidden_size),
        "b_o": jnp.zeros((output_size,), jnp.float32),
    }


if __name__ == "__main__":
    input_size, hidden_size, output_size = 16, 32, 8
    batch = 8  # multiple of the 8-sublane vreg height

    key = jax.random.PRNGKey(0)
    kx, kh, kp = jax.random.split(key, 3)

    x = jax.random.normal(kx, (batch, input_size), dtype=jnp.float32)
    hidden_state = jax.random.normal(kh, (batch, hidden_size), dtype=jnp.float32)

    torch_layout_params = init_params(kp, input_size, hidden_size, output_size)
    kernel_params = prepare_params(torch_layout_params)   # one-time layout prep

    fwd = jax.jit(custom_rnn_forward)
    output, hidden = fwd(x, hidden_state, kernel_params)
    jax.block_until_ready((output, hidden))

    # Pure-JAX reference with original PyTorch semantics / layout.
    combined = jnp.concatenate([x, hidden_state], axis=1)
    ref_hidden = jnp.tanh(
        combined @ torch_layout_params["w_ih"].T + torch_layout_params["b_ih"]
    )
    ref_o1 = jnp.tanh(
        combined @ torch_layout_params["w_io"].T + torch_layout_params["b_io"]
    )
    ref_o2 = ref_o1 @ torch_layout_params["w_o"].T + torch_layout_params["b_o"]
    ref_out = jax.nn.softmax(ref_o2, axis=1)

    assert output.shape == (batch, output_size)
    assert hidden.shape == (batch, hidden_size)
    # approx reciprocal in the softmax -> allow ~1e-3-level error on outputs.
    assert jnp.allclose(output, ref_out, atol=2e-3, rtol=2e-3)
    assert jnp.allclose(hidden, ref_hidden, atol=1e-5)

    print("KERNEL_OK")
</pallas_src>

<mosaic_0001>
module attributes {stable_mosaic.version = 11 : i64} {
  func.func @_rnn_cell_kernel(%arg0: memref<8x48xf32, #tpu.memory_space<vmem>>, %arg1: memref<48x64xf32, #tpu.memory_space<vmem>>, %arg2: memref<1x64xf32, #tpu.memory_space<vmem>>, %arg3: memref<64x8xf32, #tpu.memory_space<vmem>>, %arg4: memref<1x8xf32, #tpu.memory_space<vmem>>, %arg5: memref<8x8xf32, #tpu.memory_space<vmem>>, %arg6: memref<8x32xf32, #tpu.memory_space<vmem>>) attributes {dimension_semantics = [], scalar_prefetch = 0 : i64, scratch_operands = 0 : i64, tpu.core_type = #tpu.core_type<tc>} {
    %c0 = arith.constant 0 : index
    %c0_0 = arith.constant 0 : index
    %0 = vector.load %arg0[%c0, %c0_0] : memref<8x48xf32, #tpu.memory_space<vmem>>, vector<8x48xf32>
    %c0_1 = arith.constant 0 : index
    %c0_2 = arith.constant 0 : index
    %1 = vector.load %arg1[%c0_1, %c0_2] : memref<48x64xf32, #tpu.memory_space<vmem>>, vector<48x64xf32>
    %cst = arith.constant dense<0.000000e+00> : vector<8x64xf32>
    %2 = tpu.matmul %0, %1, %cst {dimension_numbers = #tpu.dot_dimension_numbers<[1], [0], [0], [1], [0, 0, 1, 1], [], []>} : vector<8x48xf32>, vector<48x64xf32>, vector<8x64xf32> -> vector<8x64xf32>
    %c0_3 = arith.constant 0 : index
    %c0_4 = arith.constant 0 : index
    %3 = vector.load %arg2[%c0_3, %c0_4] : memref<1x64xf32, #tpu.memory_space<vmem>>, vector<1x64xf32>
    %4 = vector.broadcast %3 : vector<1x64xf32> to vector<8x64xf32>
    %5 = arith.addf %2, %4 : vector<8x64xf32>
    %6 = math.tanh %5 : vector<8x64xf32>
    %c0_5 = arith.constant 0 : index
    %c0_6 = arith.constant 0 : index
    %7 = vector.load %arg3[%c0_5, %c0_6] : memref<64x8xf32, #tpu.memory_space<vmem>>, vector<64x8xf32>
    %cst_7 = arith.constant dense<0.000000e+00> : vector<8x8xf32>
    %8 = tpu.matmul %6, %7, %cst_7 {dimension_numbers = #tpu.dot_dimension_numbers<[1], [0], [0], [1], [0, 0, 1, 1], [], []>} : vector<8x64xf32>, vector<64x8xf32>, vector<8x8xf32> -> vector<8x8xf32>
    %c0_8 = arith.constant 0 : index
    %c0_9 = arith.constant 0 : index
    %9 = vector.load %arg4[%c0_8, %c0_9] : memref<1x8xf32, #tpu.memory_space<vmem>>, vector<1x8xf32>
    %10 = vector.broadcast %9 : vector<1x8xf32> to vector<8x8xf32>
    %11 = arith.addf %8, %10 : vector<8x8xf32>
    %cst_10 = arith.constant dense<0xFF800000> : vector<8xf32>
    %12 = vector.multi_reduction <maximumf>, %11, %cst_10 [1] : vector<8x8xf32> to vector<8xf32>
    %13 = vector.shape_cast %12 : vector<8xf32> to vector<8x1xf32>
    %14 = vector.broadcast %13 : vector<8x1xf32> to vector<8x8xf32>
    %15 = arith.subf %11, %14 : vector<8x8xf32>
    %16 = math.exp %15 : vector<8x8xf32>
    %cst_11 = arith.constant dense<0.000000e+00> : vector<8xf32>
    %17 = vector.multi_reduction <add>, %16, %cst_11 [1] : vector<8x8xf32> to vector<8xf32>
    %18 = vector.shape_cast %17 : vector<8xf32> to vector<8x1xf32>
    %19 = tpu.reciprocal %18 {approx = true} : vector<8x1xf32> -> vector<8x1xf32>
    %20 = vector.broadcast %19 : vector<8x1xf32> to vector<8x8xf32>
    %21 = arith.mulf %16, %20 : vector<8x8xf32>
    %c0_12 = arith.constant 0 : index
    %c0_13 = arith.constant 0 : index
    %22 = vector.load %arg5[%c0_12, %c0_13] : memref<8x8xf32, #tpu.memory_space<vmem>>, vector<8x8xf32>
    tpu.vector_store %arg5[%c0_12, %c0_13], %21 {strides = array<i32>} : memref<8x8xf32, #tpu.memory_space<vmem>>, vector<8x8xf32>,
    %23 = vector.extract_strided_slice %6 {offsets = [0, 0], sizes = [8, 32], strides = [1, 1]} : vector<8x64xf32> to vector<8x32xf32>
    %c0_14 = arith.constant 0 : index
    %c0_15 = arith.constant 0 : index
    %24 = vector.load %arg6[%c0_14, %c0_15] : memref<8x32xf32, #tpu.memory_space<vmem>>, vector<8x32xf32>
    tpu.vector_store %arg6[%c0_14, %c0_15], %23 {strides = array<i32>} : memref<8x32xf32, #tpu.memory_space<vmem>>, vector<8x32xf32>,
    return
  }
}

</mosaic_0001>

<bundles_post_ra>
// kernel: custom_rnn_forward.1
= control target key start
LH: loop header
LB: loop body
LE: loop exit
PB: predicated region body
PF: predicated region fallthrough
CT: control target
= control target key end

     0   :  { %12 = vsyncpa [#allocation3], 0  ;;  %v379_v3 = vmov 0.0|0.0   ;;  %vm380_vm0 = vmmov 0   ;;  %v381_v6 = vmov 0.0   ;;  %s497_s0 = inlined_call_operand.vmem [shape: f32[8,48], index: 0, kind: input, shape index: {}]   ;;  %s498_s1 = inlined_call_operand.vmem [shape: f32[48,64], index: 1, kind: input, shape index: {}]   ;;  %s499_s2 = inlined_call_operand.vmem [shape: f32[1,64], index: 2, kind: input, shape index: {}]   ;;  %s500_s3 = inlined_call_operand.vmem [shape: f32[64,8], index: 3, kind: input, shape index: {}]   ;;  %s501_s4 = inlined_call_operand.vmem [shape: f32[1,8], index: 4, kind: input, shape index: {}]   ;;  %s502_s5 = inlined_call_operand.hbm [shape: f32[8,8], index: 5, kind: output, shape index: {0}]   ;;  %s503_s6 = inlined_call_operand.hbm [shape: f32[8,32], index: 6, kind: output, shape index: {1}]  }
   0x1   :  { %v25_v0 = vld [vmem:[%s498_s1] sm:$0xff]  ;;  %v26_v1 = vld [vmem:[%s498_s1 + $0x8] sm:$0xff]  ;;  %v27_v2 = vld [vmem:[%s498_s1 + $0x10] sm:$0xff]  ;;  %299 = vmatprep.subr.bf16.mxu0 %v379_v3  ;;  %277 = vmatprep.mubr.msk.f32.mxu0 %vm380_vm0, %v381_v6 }
   0x2   :  { %v300_v4 = vpack.c.bf16 %v26_v1, %v25_v0  ;;  %v28_v5 = vld [vmem:[%s498_s1 + $0x18] sm:$0xff]  ;;  %308 = vmatprep.subr.bf16.mxu1 %v379_v3  ;;  %v113_v7 = vld [vmem:[%s500_s3] sm:$0xff]  ;;  %v114_v8 = vld [vmem:[%s500_s3 + $0x8] sm:$0xff]  ;;  %296 = vmatprep.mubr.msk.f32.mxu1 %vm380_vm0, %v381_v6 }
   0x3   :  { %v303_v9 = vpack.c.bf16 %v28_v5, %v27_v2  ;;  %v309_v10 = vpack.c.bf16 %v114_v8, %v113_v7 }
   0x4   :  { %301 = vmatpush3.bf16.msra.mxu0 %v300_v4 }
   0x5   :  { %13 = vsyncpa [#allocation5], 0  ;;  %302 = vmatprep.subr.bf16.mxu0 %v379_v3  ;;  %v29_v11 = vld [vmem:[%s498_s1 + $0x20] sm:$0xff]  ;;  %v30_v12 = vld [vmem:[%s498_s1 + $0x28] sm:$0xff]  ;;  %310 = vmatpush3.bf16.msra.mxu1 %v309_v10  ;;  %vm38_vm1 = vcmask 392192   ;;  %vm128_vm2 = vcmask 523264  }
   0x6   :  { %311 = vmatprep.subr.bf16.mxu1 %v379_v3  ;;  %v306_v13 = vpack.c.bf16 %v30_v12, %v29_v11  ;;  %v24_v14 = vld [vmem:[%s497_s0] sm:$0xff]  ;;  %v115_v15 = vld [vmem:[%s500_s3 + $0x10] sm:$0xff]  ;;  %v116_v16 = vld [vmem:[%s500_s3 + $0x18] sm:$0xff]  ;;  %vm215_vm3 = vcmask 261120   ;;  %vm202_vm4 = vcmask 64512  }
   0x7   :  { %v312_v17 = vpack.c.bf16 %v116_v16, %v115_v15  ;;  %v117_v18 = vld [vmem:[%s500_s3 + $0x20] sm:$0xff]  ;;  %v118_v19 = vld [vmem:[%s500_s3 + $0x28] sm:$0xff]  ;;  %v119_v21 = vld [vmem:[%s500_s3 + $0x30] sm:$0xff] }
   0x8   :  { %304 = vmatpush3.bf16.msra.mxu0 %v303_v9  ;;  %v315_v20 = vpack.c.bf16 %v118_v19, %v117_v18  ;;  %v120_v22 = vld [vmem:[%s500_s3 + $0x38] sm:$0xff]  ;;  %v245_v24 = vld [vmem:[%s499_s2] ss:$0 sm:$0xff]  ;;  %s382_s2 = smov [#allocation4]  }
   0x9   :  { %305 = vmatprep.subr.bf16.mxu0 %v379_v3  ;;  %313 = vmatpush3.bf16.msra.mxu1 %v312_v17  ;;  %v318_v23 = vpack.c.bf16 %v120_v22, %v119_v21  ;;  %v247_v29 = vld [vmem:[%s501_s4] ss:$0 sm:$0xff]  ;;  %s233_s3 = sshll.u32 %s382_s2, 4  ;;  %s234_s3 = int_to_ptr.vmem [resolvable:$true] %s233_s3 }
   0xa   :  { %314 = vmatprep.subr.bf16.mxu1 %v379_v3  ;;  %s331_s29 = scalar_lea.vmem %s234_s3, 128  ;;  %p336_p1 = scmp.lt.s32.totalorder %s234_s3, %s234_s3 }
   0xb   :  { %p332_p0 = scmp.ne.s32.totalorder %s234_s3, %s331_s29  ;;  %p337_p2 = scmp.lt.s32.totalorder %s331_s29, %s331_s29 }
   0xc   :  { %307 = vmatpush3.bf16.msra.mxu0 %v306_v13 }
   0xd   :  { %316 = vmatpush3.bf16.msra.mxu1 %v315_v20  ;;  %p338_p3 = por %p337_p2, %p336_p1 }
   0xe   :  { %317 = vmatprep.subr.bf16.mxu1 %v379_v3 }
   0xf   :  { %278 = vmatmul.mubr.msk.f32.vlgmr.msra.gmra.mrb[0].mxu0 %vm38_vm1, %v24_v14  ;;  %p339_p4 = pnand %p338_p3, %p332_p0 }
  0x11   :  { %319 = vmatpush3.bf16.msra.mxu1 %v318_v23 }
  0xe2   :  { %v108_v25 = vpop.f32.mrb[0].mxu0 }
  0xe3   :  { %v109_v26 = vadd.f32 %v245_v24, %v108_v25  ;;  %v279_v27 = vpop.f32.mrb[1].mxu0 }
  0xe5   :  { %325 = vtanh.f32 %v109_v26 }
  0xef   :  { %v326_v28 = vpop.eup %325 }
  0xf0   :  { %297 = vmatmul.mubr.msk.f32.vlgmr.msra.gmra.mrb[0].mxu1 %vm128_vm2, %v326_v28  ;;  %216 = vst.msk [vmem:[#allocation4] sm:$0xff] %vm215_vm3, %v326_v28 }
 0x1c3   :  { %v198_v30 = vpop.f32.mrb[0].mxu1 }
 0x1c4   :  { %v199_v31 = vadd.f32 %v247_v29, %v198_v30  ;;  %v298_v32 = vpop.f32.mrb[1].mxu1 }
 0x1c6   :  { %v203_v33 = vsel %vm202_vm4, %v199_v31, -inf }
 0x1c7   :  { %204 = vmax.xlane.f32.xlu0 %v203_v33 }
 0x254   :  { %v205_v34 = vpop.xlane.xlu0 %204 }
 0x255   :  { %v206_v35 = vsub.f32 %v199_v31, %v205_v34 }
 0x257   :  { %v207_v36 = vmul.f32 1.442695, %v206_v35 }
 0x259   :  { %327 = vpow2.f32 %v207_v36 }
 0x263   :  { %v328_v37 = vpop.eup %327 }
 0x264   :  { %v209_v38 = vsel %vm202_vm4, %v328_v37, 0.0 }
 0x265   :  { %210 = vadd.xlane.f32.xlu0 %v209_v38 }
 0x266   :  { %342 = shalt.err (!%p339_p4)
}
 0x267   :  { %s343_s7 = scalar_lea.hbm %s503_s6, 128 }
 0x268   :  { %p344_p5 = scmp.ne.s32.totalorder %s503_s6, %s343_s7  ;;  %p347_p6 = scmp.lt.u32.totalorder %s343_s7, %s503_s6 }
 0x26a   :  { %p349_p7 = pnand %p347_p6, %p344_p5 }
 0x26c   :  { %352 = shalt.err (!%p349_p7)
}
 0x26d   :  { %236 = dma.vmem_to_hbm [thread:$0]  %s234_s3, 128, %s503_s6, [#allocation5]  }
 0x26e   :  { %s383_s14 = smov [#allocation2]  }
 0x26f   :  { %s223_s15 = sshll.u32 %s383_s14, 4  ;;  %s224_s15 = int_to_ptr.vmem [resolvable:$true] %s223_s15 }
 0x270   :  { %s353_s16 = scalar_lea.vmem %s224_s15, 128  ;;  %p358_p9 = scmp.lt.s32.totalorder %s224_s15, %s224_s15 }
 0x271   :  { %p354_p8 = scmp.ne.s32.totalorder %s224_s15, %s353_s16  ;;  %p359_p10 = scmp.lt.s32.totalorder %s353_s16, %s353_s16 }
 0x273   :  { %p360_p11 = por %p359_p10, %p358_p9 }
 0x275   :  { %p361_p12 = pnand %p360_p11, %p354_p8 }
 0x2f2   :  { %v211_v39 = vpop.xlane.xlu0 %210 }
 0x2f3   :  { %329 = vrcp.f32 %v211_v39 }
 0x2fd   :  { %v330_v40 = vpop.eup %329 }
 0x2fe   :  { %v213_v41 = vmul.f32 %v330_v40, %v328_v37 }
 0x300   :  { %214 = vst.msk [vmem:[#allocation2] sm:$0xff] %vm202_vm4, %v213_v41 }
 0x301   :  { %364 = shalt.err (!%p361_p12)
}
 0x302   :  { %s365_s6 = scalar_lea.hbm %s502_s5, 128 }
 0x303   :  { %p366_p13 = scmp.ne.s32.totalorder %s502_s5, %s365_s6  ;;  %p369_p0 = scmp.lt.u32.totalorder %s365_s6, %s502_s5 }
 0x305   :  { %p371_p1 = pnand %p369_p0, %p366_p13 }
 0x307   :  { %374 = shalt.err (!%p371_p1)
}
 0x308   :  { %226 = dma.vmem_to_hbm [thread:$0]  %s224_s15, 128, %s502_s5, [#allocation3]  }
 0x309   :  { %375 = dma.done.wait [#allocation3], 128  }
 0x30a   :  { %376 = vsyncadd [#allocation3], 4294967168 }
 0x30b   :  { %377 = dma.done.wait [#allocation5], 128  }
 0x30c   :  { %378 = vsyncadd [#allocation5], 4294967168 }
 0x30d   :  { %243 = vsyncpa [#allocation3], 1 }
 0x30e   :  { %244 = vsyncpa [#allocation5], 1 }

</bundles_post_ra>
